<compile_context>
chip_gen: v7x
topology: tpu7x:2x2x1
jax: 0.10.0
libtpu: 0.0.40
codegen_flags: <defaults>
</compile_context>

<pallas_src>
import jax
import jax.numpy as jnp
from jax.experimental import pallas as pl
from jax.experimental.pallas import tpu as pltpu

LANE = 128
SUBLANE = 8
BN_EPS = 1e-6


def _round_up(x, m):
    return ((x + m - 1) // m) * m


# ----------------------------- kernel -----------------------------------------
def mlp_kernel(x_ref, w1_ref, b1_ref, w2_ref, b2_ref, o_ref):
    """One row-tile of: (Linear with BN folded in) -> ReLU -> Dropout(eval) -> Linear."""
    # First Linear (BN folded): bf16 operands, f32 MXU accumulation. Hidden is lane-dense.
    h = jnp.dot(x_ref[...], w1_ref[...], preferred_element_type=jnp.float32)
    h = h + b1_ref[...]                 # [1, Hp] f32 bias broadcast (f32 VPU, v5e-safe)
    h = jnp.maximum(h, 0.0)             # ReLU
    # Dropout (eval mode) -> identity.
    # Second Linear: downcast hidden to bf16 for the MXU, keep f32 accumulation.
    out = jnp.dot(h.astype(jnp.bfloat16), w2_ref[...],
                  preferred_element_type=jnp.float32)
    o_ref[...] = (out + b2_ref[...]).astype(o_ref.dtype)   # lane-dense (N padded to 128) store


# ----------------------------- param prep --------------------------------------
def init_params(key, dim_input, dim_hidden, dim_output):
    """PyTorch-style deterministic init for Linear/BatchNorm1d (eval running stats)."""
    k1, k2, k3, k4, k5, k6 = jax.random.split(key, 6)
    bound1 = 1.0 / (dim_input ** 0.5)
    w1 = jax.random.uniform(k1, (dim_input, dim_hidden), jnp.float32, -bound1, bound1)
    b1 = jax.random.uniform(k2, (1, dim_hidden), jnp.float32, -bound1, bound1)
    bound2 = 1.0 / (dim_hidden ** 0.5)
    w2 = jax.random.uniform(k3, (dim_hidden, dim_output), jnp.float32, -bound2, bound2)
    b2 = jax.random.uniform(k4, (1, dim_output), jnp.float32, -bound2, bound2)
    gamma = 1.0 + 0.1 * jax.random.normal(k5, (1, dim_hidden), jnp.float32)
    beta = 0.1 * jax.random.normal(k6, (1, dim_hidden), jnp.float32)
    run_mean = 0.05 * jnp.arange(dim_hidden, dtype=jnp.float32).reshape(1, dim_hidden) / dim_hidden
    run_var = jnp.ones((1, dim_hidden), jnp.float32) * 1.5
    return (w1, b1, gamma, beta, run_mean, run_var, w2, b2)


def prepare_params(params, eps=BN_EPS):
    """One-time transform: fold eval-mode BN into Linear1, zero-pad hidden and output dims
    to lane-dense multiples of 128, store weights in bf16 (biases stay f32)."""
    (w1, b1, gamma, beta, run_mean, run_var, w2, b2) = params
    scale = gamma * jax.lax.rsqrt(run_var + eps)            # [1, H]
    w1f = w1 * scale                                        # per-output-column scale
    b1f = (b1 - run_mean) * scale + beta                    # [1, H]

    dim_hid = int(w1.shape[1])
    dim_out = int(w2.shape[1])
    h_pad = _round_up(dim_hid, LANE)
    n_pad = _round_up(dim_out, LANE)

    # Pad hidden: extra w1 cols = 0, extra b1 cols = 0 -> padded hidden activations are 0;
    # padded w2 rows = 0 -> they contribute nothing to the output. Math is unchanged.
    w1p = jnp.pad(w1f, ((0, 0), (0, h_pad - dim_hid)))
    b1p = jnp.pad(b1f, ((0, 0), (0, h_pad - dim_hid)))
    w2p = jnp.pad(w2, ((0, h_pad - dim_hid), (0, n_pad - dim_out)))
    b2p = jnp.pad(b2, ((0, 0), (0, n_pad - dim_out)))

    folded = (w1p.astype(jnp.bfloat16), b1p.astype(jnp.float32),
              w2p.astype(jnp.bfloat16), b2p.astype(jnp.float32))
    return folded, dim_out


# ----------------------------- wrapper ------------------------------------------
def _pick_row_tiling(n_rows, din, hid_p, nout_p, vmem_budget_bytes):
    """Pick (row_tile, num_tiles): largest tile that fits VMEM, then shrink it to the
    smallest multiple of 8 covering the batch in the same number of grid steps."""
    def footprint(tm):
        return (2 * tm * din * 2            # double-buffered x tile (bf16)
                + 2 * tm * nout_p * 4       # double-buffered output tile (f32)
                + din * hid_p * 2           # resident w1 (bf16)
                + hid_p * 4                 # resident b1 (f32)
                + hid_p * nout_p * 2        # resident w2 (bf16)
                + nout_p * 4                # resident b2 (f32)
                + tm * hid_p * 4            # f32 hidden intermediate
                + tm * nout_p * 4)          # f32 pre-store intermediate

    tmax = SUBLANE
    for cand in (1024, 512, 256, 128, 64, 32, 16, 8):
        if footprint(cand) <= vmem_budget_bytes:
            tmax = cand
            break

    n_eff = max(n_rows, SUBLANE)
    num_tiles = -(-n_eff // tmax)                      # fewest grid steps
    tm = _round_up(-(-n_eff // num_tiles), SUBLANE)    # least batch padding for that count
    return tm, num_tiles


def mlp_forward(x, folded_params, dim_out):
    w1, b1, w2, b2 = folded_params
    n, din = x.shape
    hid_p = int(w1.shape[1])
    nout_p = int(w2.shape[1])

    # Conservative budget so the same tiling fits v5e/v6e (128 MiB) and v7x (64 MiB physical).
    vmem_budget = 24 * 1024 * 1024
    tm, num_tiles = _pick_row_tiling(n, din, hid_p, nout_p, vmem_budget)
    n_pad = tm * num_tiles

    xb = x.astype(jnp.bfloat16)
    if n_pad != n:
        xb = jnp.pad(xb, ((0, n_pad - n), (0, 0)))

    grid = (num_tiles,)
    flops = 2 * n_pad * (din * hid_p + hid_p * nout_p)
    bytes_accessed = (n_pad * din * 2 + din * hid_p * 2 + hid_p * 4
                      + hid_p * nout_p * 2 + nout_p * 4 + n_pad * nout_p * 4)

    out = pl.pallas_call(
        mlp_kernel,
        out_shape=jax.ShapeDtypeStruct((n_pad, nout_p), jnp.float32),
        grid=grid,
        in_specs=[
            pl.BlockSpec((tm, din), lambda i: (i, 0)),        # x row tile
            pl.BlockSpec((din, hid_p), lambda i: (0, 0)),     # w1 (resident, lane-padded)
            pl.BlockSpec((1, hid_p), lambda i: (0, 0)),       # b1 (resident)
            pl.BlockSpec((hid_p, nout_p), lambda i: (0, 0)),  # w2 (resident, lane-padded)
            pl.BlockSpec((1, nout_p), lambda i: (0, 0)),      # b2 (resident, lane-padded)
        ],
        out_specs=pl.BlockSpec((tm, nout_p), lambda i: (i, 0)),
        compiler_params=pltpu.CompilerParams(
            dimension_semantics=("parallel",),
            vmem_limit_bytes=32 * 1024 * 1024,
        ),
        cost_estimate=pl.CostEstimate(flops=flops, transcendentals=0,
                                      bytes_accessed=bytes_accessed),
    )(xb, w1, b1, w2, b2)

    return out[:n, :dim_out]


# ----------------------------- references ---------------------------------------
def mlp_reference_f32(x, params, eps=BN_EPS):
    (w1, b1, gamma, beta, run_mean, run_var, w2, b2) = params
    h = x @ w1 + b1
    h = (h - run_mean) * jax.lax.rsqrt(run_var + eps) * gamma + beta
    h = jnp.maximum(h, 0.0)
    return h @ w2 + b2


def mlp_reference_bf16(x, params, eps=BN_EPS):
    """Same math with the kernel's bf16-matmul / f32-accumulate casts."""
    (w1, b1, gamma, beta, run_mean, run_var, w2, b2) = params
    scale = gamma * jax.lax.rsqrt(run_var + eps)
    w1f = (w1 * scale).astype(jnp.bfloat16)
    b1f = (b1 - run_mean) * scale + beta
    h = jnp.dot(x.astype(jnp.bfloat16), w1f, preferred_element_type=jnp.float32) + b1f
    h = jnp.maximum(h, 0.0)
    out = jnp.dot(h.astype(jnp.bfloat16), w2.astype(jnp.bfloat16),
                  preferred_element_type=jnp.float32) + b2
    return out


# ----------------------------- test ---------------------------------------------
if __name__ == "__main__":
    batch, dim_input, dim_hidden, dim_output = 300, 32, 64, 16  # batch not a tile multiple on purpose

    key = jax.random.PRNGKey(0)
    kx, kp = jax.random.split(key)
    x = jax.random.normal(kx, (batch, dim_input), jnp.float32)
    params = init_params(kp, dim_input, dim_hidden, dim_output)
    folded, dim_out = prepare_params(params)

    out = mlp_forward(x, folded, dim_out)
    out = jax.block_until_ready(out)

    assert out.shape == (batch, dim_output)
    ref_bf16 = mlp_reference_bf16(x, params)
    ref_f32 = mlp_reference_f32(x, params)
    assert jnp.allclose(out, ref_bf16, atol=2e-3, rtol=2e-3), "mismatch vs bf16-matched reference"
    assert jnp.allclose(out, ref_f32, atol=5e-2, rtol=5e-2), "mismatch vs f32 reference"

    print("KERNEL_OK")
</pallas_src>

<mosaic_0001>
module attributes {stable_mosaic.version = 11 : i64} {
  func.func @mlp_kernel(%arg0: i32, %arg1: memref<304x32xbf16, #tpu.memory_space<vmem>>, %arg2: memref<32x128xbf16, #tpu.memory_space<vmem>>, %arg3: memref<1x128xf32, #tpu.memory_space<vmem>>, %arg4: memref<128x128xbf16, #tpu.memory_space<vmem>>, %arg5: memref<1x128xf32, #tpu.memory_space<vmem>>, %arg6: memref<304x128xf32, #tpu.memory_space<vmem>>) attributes {dimension_semantics = [#tpu.dimension_semantics<parallel>], iteration_bounds = array<i64: 1>, scalar_prefetch = 0 : i64, scratch_operands = 0 : i64, tpu.core_type = #tpu.core_type<tc>, window_params = [{transform_indices = @transform_0, window_bounds = array<i64: 304, 32>}, {pipeline_mode = #tpu.pipeline_mode<synchronous>, transform_indices = @transform_1, window_bounds = array<i64: 32, 128>}, {pipeline_mode = #tpu.pipeline_mode<synchronous>, transform_indices = @transform_2, window_bounds = array<i64: 1, 128>}, {pipeline_mode = #tpu.pipeline_mode<synchronous>, transform_indices = @transform_3, window_bounds = array<i64: 128, 128>}, {pipeline_mode = #tpu.pipeline_mode<synchronous>, transform_indices = @transform_4, window_bounds = array<i64: 1, 128>}, {transform_indices = @transform_5, window_bounds = array<i64: 304, 128>}]} {
    %c0 = arith.constant 0 : index
    %c0_0 = arith.constant 0 : index
    %0 = vector.load %arg1[%c0, %c0_0] : memref<304x32xbf16, #tpu.memory_space<vmem>>, vector<304x32xbf16>
    %c0_1 = arith.constant 0 : index
    %c0_2 = arith.constant 0 : index
    %1 = vector.load %arg2[%c0_1, %c0_2] : memref<32x128xbf16, #tpu.memory_space<vmem>>, vector<32x128xbf16>
    %cst = arith.constant dense<0.000000e+00> : vector<304x128xf32>
    %2 = tpu.matmul %0, %1, %cst {dimension_numbers = #tpu.dot_dimension_numbers<[1], [0], [0], [1], [0, 0, 1, 1], [], []>} : vector<304x32xbf16>, vector<32x128xbf16>, vector<304x128xf32> -> vector<304x128xf32>
    %c0_3 = arith.constant 0 : index
    %c0_4 = arith.constant 0 : index
    %3 = vector.load %arg3[%c0_3, %c0_4] : memref<1x128xf32, #tpu.memory_space<vmem>>, vector<1x128xf32>
    %4 = vector.broadcast %3 : vector<1x128xf32> to vector<304x128xf32>
    %5 = arith.addf %2, %4 : vector<304x128xf32>
    %cst_5 = arith.constant 0.000000e+00 : f32
    %6 = vector.broadcast %cst_5 : f32 to vector<304x128xf32>
    %7 = arith.maximumf %5, %6 : vector<304x128xf32>
    %8 = arith.truncf %7 : vector<304x128xf32> to vector<304x128xbf16>
    %c0_6 = arith.constant 0 : index
    %c0_7 = arith.constant 0 : index
    %9 = vector.load %arg4[%c0_6, %c0_7] : memref<128x128xbf16, #tpu.memory_space<vmem>>, vector<128x128xbf16>
    %cst_8 = arith.constant dense<0.000000e+00> : vector<304x128xf32>
    %10 = tpu.matmul %8, %9, %cst_8 {dimension_numbers = #tpu.dot_dimension_numbers<[1], [0], [0], [1], [0, 0, 1, 1], [], []>} : vector<304x128xbf16>, vector<128x128xbf16>, vector<304x128xf32> -> vector<304x128xf32>
    %c0_9 = arith.constant 0 : index
    %c0_10 = arith.constant 0 : index
    %11 = vector.load %arg5[%c0_9, %c0_10] : memref<1x128xf32, #tpu.memory_space<vmem>>, vector<1x128xf32>
    %12 = vector.broadcast %11 : vector<1x128xf32> to vector<304x128xf32>
    %13 = arith.addf %10, %12 : vector<304x128xf32>
    %c0_11 = arith.constant 0 : index
    %c0_12 = arith.constant 0 : index
    %14 = vector.load %arg6[%c0_11, %c0_12] : memref<304x128xf32, #tpu.memory_space<vmem>>, vector<304x128xf32>
    tpu.vector_store %arg6[%c0_11, %c0_12], %13 {strides = array<i32>} : memref<304x128xf32, #tpu.memory_space<vmem>>, vector<304x128xf32>,
    return
  }
  func.func @transform_0(%arg0: i32) -> (i32, i32) {
    %c0_i32 = arith.constant 0 : i32
    %c0_i32_0 = arith.constant 0 : i32
    return %arg0, %c0_i32 : i32, i32
  }
  func.func @transform_1(%arg0: i32) -> (i32, i32) {
    %c0_i32 = arith.constant 0 : i32
    %c0_i32_0 = arith.constant 0 : i32
    %c0_i32_1 = arith.constant 0 : i32
    return %c0_i32, %c0_i32_0 : i32, i32
  }
  func.func @transform_2(%arg0: i32) -> (i32, i32) {
    %c0_i32 = arith.constant 0 : i32
    %c0_i32_0 = arith.constant 0 : i32
    %c0_i32_1 = arith.constant 0 : i32
    return %c0_i32, %c0_i32_0 : i32, i32
  }
  func.func @transform_3(%arg0: i32) -> (i32, i32) {
    %c0_i32 = arith.constant 0 : i32
    %c0_i32_0 = arith.constant 0 : i32
    %c0_i32_1 = arith.constant 0 : i32
    return %c0_i32, %c0_i32_0 : i32, i32
  }
  func.func @transform_4(%arg0: i32) -> (i32, i32) {
    %c0_i32 = arith.constant 0 : i32
    %c0_i32_0 = arith.constant 0 : i32
    %c0_i32_1 = arith.constant 0 : i32
    return %c0_i32, %c0_i32_0 : i32, i32
  }
  func.func @transform_5(%arg0: i32) -> (i32, i32) {
    %c0_i32 = arith.constant 0 : i32
    %c0_i32_0 = arith.constant 0 : i32
    return %arg0, %c0_i32 : i32, i32
  }
}

</mosaic_0001>

<bundles_post_ra>
// kernel: tpu_custom_call.1
= control target key start
LH: loop header
LB: loop body
LE: loop exit
PB: predicated region body
PF: predicated region fallthrough
CT: control target
= control target key end

     0   :  { %v1132_v1 = vmov 0.0   ;;  %vm1133_vm0 = vmmov 0   ;;  %vm178_vm1 = vcmask 261120   ;;  %s1465_s0 = inlined_call_operand.vmem [shape: bf16[304,32], index: 0, kind: input, shape index: {}]   ;;  %s1466_s1 = inlined_call_operand.vmem [shape: bf16[32,128], index: 1, kind: input, shape index: {}]   ;;  %s1467_s2 = inlined_call_operand.vmem [shape: f32[1,128], index: 2, kind: input, shape index: {}]   ;;  %s1468_s3 = inlined_call_operand.vmem [shape: bf16[128,128], index: 3, kind: input, shape index: {}]   ;;  %s1469_s4 = inlined_call_operand.vmem [shape: f32[1,128], index: 4, kind: input, shape index: {}]   ;;  %s1470_s5 = inlined_call_operand.hbm [shape: f32[304,128], index: 5, kind: output, shape index: {}]  }
   0x1   :  { %v1079_v0 = vld [vmem:[%s1466_s1] sm:$0xff]   ;;  %886 = vmatprep.subr.bf16.mxu0 %v1132_v1  ;;  %1058 = vmatprep.subr.bf16.mxu1 %v1132_v1  ;;  %v1080_v2 = vld [vmem:[%s1466_s1 + $0x8] sm:$0xff]   ;;  %v1083_v5 = vld [vmem:[%s1465_s0 + $0x10] sm:$0xff]  }
   0x2   :  { %887 = vmatpush3.bf16.msra.mxu0 %v1079_v0  ;;  %890 = vmatprep.mubr.msk.bf16.mxu0 %vm1133_vm0, %v1132_v1  ;;  %v1081_v3 = vld [vmem:[%s1465_s0] sm:$0xff]   ;;  %v1082_v4 = vld [vmem:[%s1465_s0 + $0x8] sm:$0xff]  }
   0x3   :  { %888 = vmatprep.subr.bf16.mxu0 %v1132_v1  ;;  %986 = vmatprep.mubr.msk.bf16.mxu1 %vm1133_vm0, %v1132_v1  ;;  %v1100_v6 = vld [vmem:[%s1468_s3] sm:$0xff]   ;;  %v1101_v7 = vld [vmem:[%s1468_s3 + $0x8] sm:$0xff]  }
   0x4   :  { %1066 = vmatpush3.bf16.msra.mxu1 %v1100_v6 }
   0x5   :  { %1059 = vmatprep.subr.bf16.mxu1 %v1132_v1 }
   0x6   :  { %889 = vmatpush3.bf16.msra.mxu0 %v1080_v2 }
   0x7   :  { %966 = vmatprep.subr.bf16.mxu0 %v1132_v1 }
   0x9   :  { %891 = vmatmul.mubr.msk.bf16.vlgmr.msra.gmra.mrb[0].mxu0 %vm178_vm1, %v1081_v3 }
   0xa   :  { %894 = vmatprep.mubr.msk.bf16.mxu0 %vm1133_vm0, %v1132_v1  ;;  %967 = vmatpush3.bf16.msra.mxu0 %v1100_v6 }
   0xb   :  { %968 = vmatprep.subr.bf16.mxu0 %v1132_v1 }
  0x11   :  { %895 = vmatmul.mubr.msk.bf16.gmra.mrb[4].mxu0 %vm178_vm1, %v1082_v4 }
  0x12   :  { %898 = vmatprep.mubr.msk.bf16.mxu0 %vm1133_vm0, %v1132_v1 }
  0x19   :  { %899 = vmatmul.mubr.msk.bf16.gmra.mrb[8].mxu0 %vm178_vm1, %v1083_v5 }
  0x1a   :  { %902 = vmatprep.mubr.msk.bf16.mxu0 %vm1133_vm0, %v1132_v1 }
  0x1b   :  { %10 = vsyncpa [#allocation3], 0  ;;  %v1084_v8 = vld [vmem:[%s1465_s0 + $0x18] sm:$0xff]   ;;  %969 = vmatpush3.bf16.msra.mxu0 %v1101_v7  ;;  %v1102_v9 = vld [vmem:[%s1468_s3 + $0x10] sm:$0xff]   ;;  %1067 = vmatpush3.bf16.msra.mxu1 %v1101_v7 }
  0x1c   :  { %970 = vmatprep.subr.bf16.mxu0 %v1132_v1  ;;  %1060 = vmatprep.subr.bf16.mxu1 %v1132_v1  ;;  %v1103_v10 = vld [vmem:[%s1468_s3 + $0x18] sm:$0xff]   ;;  %v1085_v11 = vld [vmem:[%s1465_s0 + $0x20] sm:$0xff]   ;;  %v1105_v13 = vld [vmem:[%s1468_s3 + $0x28] sm:$0xff]  }
  0x1d   :  { %v1104_v12 = vld [vmem:[%s1468_s3 + $0x20] sm:$0xff]   ;;  %v1086_v14 = vld [vmem:[%s1465_s0 + $0x28] sm:$0xff]   ;;  %v1087_v15 = vld [vmem:[%s1465_s0 + $0x30] sm:$0xff]  }
  0x1e   :  { %v1088_v16 = vld [vmem:[%s1465_s0 + $0x38] sm:$0xff]   ;;  %v1089_v17 = vld [vmem:[%s1465_s0 + $0x40] sm:$0xff]   ;;  %v1090_v18 = vld [vmem:[%s1465_s0 + $0x48] sm:$0xff]  }
  0x1f   :  { %971 = vmatpush3.bf16.msra.mxu0 %v1102_v9  ;;  %1068 = vmatpush3.bf16.msra.mxu1 %v1102_v9  ;;  %v1091_v19 = vld [vmem:[%s1465_s0 + $0x50] sm:$0xff]   ;;  %v1092_v21 = vld [vmem:[%s1465_s0 + $0x58] sm:$0xff]   ;;  %v1093_v23 = vld [vmem:[%s1465_s0 + $0x60] sm:$0xff]  }
  0x20   :  { %972 = vmatprep.subr.bf16.mxu0 %v1132_v1  ;;  %1061 = vmatprep.subr.bf16.mxu1 %v1132_v1  ;;  %v1106_v20 = vld [vmem:[%s1468_s3 + $0x30] sm:$0xff]   ;;  %v1107_v22 = vld [vmem:[%s1468_s3 + $0x38] sm:$0xff]   ;;  %v1094_v24 = vld [vmem:[%s1465_s0 + $0x68] sm:$0xff]  }
  0x21   :  { %903 = vmatmul.mubr.msk.bf16.gmra.mrb[12].mxu0 %vm178_vm1, %v1084_v8  ;;  %v1095_v25 = vld [vmem:[%s1465_s0 + $0x70] sm:$0xff]   ;;  %v1096_v26 = vld [vmem:[%s1465_s0 + $0x78] sm:$0xff]   ;;  %v1097_v27 = vld [vmem:[%s1465_s0 + $0x80] sm:$0xff]  }
  0x22   :  { %906 = vmatprep.mubr.msk.bf16.mxu0 %vm1133_vm0, %v1132_v1  ;;  %v1098_v28 = vld [vmem:[%s1465_s0 + $0x88] sm:$0xff]   ;;  %v1099_v29 = vld [vmem:[%s1465_s0 + $0x90] sm:$0xff]   ;;  %v1336_v30 = vld [vmem:[%s1467_s2] ss:$0 sm:$0xff] }
  0x23   :  { %973 = vmatpush3.bf16.msra.mxu0 %v1103_v10  ;;  %1069 = vmatpush3.bf16.msra.mxu1 %v1103_v10 }
  0x24   :  { %974 = vmatprep.subr.bf16.mxu0 %v1132_v1  ;;  %1062 = vmatprep.subr.bf16.mxu1 %v1132_v1 }
  0x27   :  { %975 = vmatpush3.bf16.msra.mxu0 %v1104_v12  ;;  %1070 = vmatpush3.bf16.msra.mxu1 %v1104_v12 }
  0x28   :  { %976 = vmatprep.subr.bf16.mxu0 %v1132_v1  ;;  %1063 = vmatprep.subr.bf16.mxu1 %v1132_v1 }
  0x29   :  { %907 = vmatmul.mubr.msk.bf16.gmra.mrb[16].mxu0 %vm178_vm1, %v1085_v11 }
  0x2a   :  { %910 = vmatprep.mubr.msk.bf16.mxu0 %vm1133_vm0, %v1132_v1 }
  0x2b   :  { %977 = vmatpush3.bf16.msra.mxu0 %v1105_v13  ;;  %1071 = vmatpush3.bf16.msra.mxu1 %v1105_v13 }
  0x2c   :  { %978 = vmatprep.subr.bf16.mxu0 %v1132_v1  ;;  %1064 = vmatprep.subr.bf16.mxu1 %v1132_v1 }
  0x2f   :  { %979 = vmatpush3.bf16.msra.mxu0 %v1106_v20  ;;  %1072 = vmatpush3.bf16.msra.mxu1 %v1106_v20 }
  0x30   :  { %980 = vmatprep.subr.bf16.mxu0 %v1132_v1  ;;  %1065 = vmatprep.subr.bf16.mxu1 %v1132_v1 }
  0x31   :  { %911 = vmatmul.mubr.msk.bf16.gmra.mrb[20].mxu0 %vm178_vm1, %v1086_v14 }
  0x32   :  { %914 = vmatprep.mubr.msk.bf16.mxu0 %vm1133_vm0, %v1132_v1 }
  0x33   :  { %981 = vmatpush3.bf16.msra.mxu0 %v1107_v22  ;;  %1073 = vmatpush3.bf16.msra.mxu1 %v1107_v22 }
  0x39   :  { %915 = vmatmul.mubr.msk.bf16.gmra.mrb[24].mxu0 %vm178_vm1, %v1087_v15 }
  0x3a   :  { %918 = vmatprep.mubr.msk.bf16.mxu0 %vm1133_vm0, %v1132_v1 }
  0x41   :  { %919 = vmatmul.mubr.msk.bf16.gmra.mrb[28].mxu0 %vm178_vm1, %v1088_v16 }
  0x42   :  { %922 = vmatprep.mubr.msk.bf16.mxu0 %vm1133_vm0, %v1132_v1 }
  0x49   :  { %923 = vmatmul.mubr.msk.bf16.gmra.mrb[32].mxu0 %vm178_vm1, %v1089_v17 }
  0x4a   :  { %926 = vmatprep.mubr.msk.bf16.mxu0 %vm1133_vm0, %v1132_v1 }
  0x51   :  { %927 = vmatmul.mubr.msk.bf16.gmra.mrb[36].mxu0 %vm178_vm1, %v1090_v18 }
  0x52   :  { %930 = vmatprep.mubr.msk.bf16.mxu0 %vm1133_vm0, %v1132_v1 }
  0x59   :  { %931 = vmatmul.mubr.msk.bf16.gmra.mrb[40].mxu0 %vm178_vm1, %v1091_v19 }
  0x5a   :  { %934 = vmatprep.mubr.msk.bf16.mxu0 %vm1133_vm0, %v1132_v1 }
  0x61   :  { %935 = vmatmul.mubr.msk.bf16.gmra.mrb[44].mxu0 %vm178_vm1, %v1092_v21 }
  0x62   :  { %938 = vmatprep.mubr.msk.bf16.mxu0 %vm1133_vm0, %v1132_v1 }
  0x69   :  { %939 = vmatmul.mubr.msk.bf16.gmra.mrb[48].mxu0 %vm178_vm1, %v1093_v23 }
  0x6a   :  { %942 = vmatprep.mubr.msk.bf16.mxu0 %vm1133_vm0, %v1132_v1 }
  0x71   :  { %943 = vmatmul.mubr.msk.bf16.gmra.mrb[52].mxu0 %vm178_vm1, %v1094_v24 }
  0x72   :  { %946 = vmatprep.mubr.msk.bf16.mxu0 %vm1133_vm0, %v1132_v1 }
  0x79   :  { %947 = vmatmul.mubr.msk.bf16.gmra.mrb[56].mxu0 %vm178_vm1, %v1095_v25 }
  0x7a   :  { %950 = vmatprep.mubr.msk.bf16.mxu0 %vm1133_vm0, %v1132_v1 }
  0x81   :  { %951 = vmatmul.mubr.msk.bf16.gmra.mrb[60].mxu0 %vm178_vm1, %v1096_v26 }
  0x82   :  { %954 = vmatprep.mubr.msk.bf16.mxu0 %vm1133_vm0, %v1132_v1 }
  0x89   :  { %955 = vmatmul.mubr.msk.bf16.gmra.mrb[64].mxu0 %vm178_vm1, %v1097_v27 }
  0x8a   :  { %958 = vmatprep.mubr.msk.bf16.mxu0 %vm1133_vm0, %v1132_v1 }
  0x91   :  { %959 = vmatmul.mubr.msk.bf16.gmra.mrb[68].mxu0 %vm178_vm1, %v1098_v28 }
  0x92   :  { %962 = vmatprep.mubr.msk.bf16.mxu0 %vm1133_vm0, %v1132_v1 }
  0x99   :  { %963 = vmatmul.mubr.msk.bf16.gmra.mrb[72].mxu0 %vm178_vm1, %v1099_v29 }
  0x9a   :  { %982 = vmatprep.mubr.msk.bf16.mxu0 %vm1133_vm0, %v1132_v1 }
  0xdc   :  { %v270_v31 = vpop.f32.mrb[0].mxu0 }
  0xdd   :  { %v271_v32 = vadd.f32 %v1336_v30, %v270_v31  ;;  %v892_v33 = vpop.f32.mrb[1].mxu0 }
  0xde   :  { %v273_v34 = vpop.f32.mrb[2].mxu0 }
  0xdf   :  { %v274_v35 = vadd.f32 %v1336_v30, %v273_v34  ;;  %v893_v36 = vpop.f32.mrb[3].mxu0  ;;  %v421_v37 = vmax.f32 %v271_v32, 0.0 }
  0xe1   :  { %v422_v38 = vmax.f32 %v274_v35, 0.0 }
  0xe3   :  { %v459_v39 = vpack.c.bf16 %v422_v38, %v421_v37 }
  0xe4   :  { %v278_v40 = vpop.f32.mrb[4].mxu0 }
  0xe5   :  { %v279_v41 = vadd.f32 %v1336_v30, %v278_v40  ;;  %v896_v42 = vpop.f32.mrb[5].mxu0  ;;  %983 = vmatmul.mubr.bf16.vlgmr.msra.gmra.mrb[76].mxu0 %v459_v39 }
  0xe6   :  { %v281_v43 = vpop.f32.mrb[6].mxu0 }
  0xe7   :  { %v282_v44 = vadd.f32 %v1336_v30, %v281_v43  ;;  %v897_v45 = vpop.f32.mrb[7].mxu0  ;;  %v423_v46 = vmax.f32 %v279_v41, 0.0 }
  0xe9   :  { %v424_v47 = vmax.f32 %v282_v44, 0.0 }
  0xeb   :  { %v460_v48 = vpack.c.bf16 %v424_v47, %v423_v46 }
  0xec   :  { %v286_v49 = vpop.f32.mrb[8].mxu0 }
  0xed   :  { %v287_v50 = vadd.f32 %v1336_v30, %v286_v49  ;;  %v900_v51 = vpop.f32.mrb[9].mxu0  ;;  %987 = vmatmul.mubr.bf16.vlgmr.msra.gmra.mrb[0].mxu1 %v460_v48 }
  0xee   :  { %v289_v52 = vpop.f32.mrb[10].mxu0  ;;  %990 = vmatprep.mubr.msk.bf16.mxu1 %vm1133_vm0, %v1132_v1 }
  0xef   :  { %v290_v53 = vadd.f32 %v1336_v30, %v289_v52  ;;  %v901_v54 = vpop.f32.mrb[11].mxu0  ;;  %v425_v55 = vmax.f32 %v287_v50, 0.0 }
  0xf1   :  { %v426_v56 = vmax.f32 %v290_v53, 0.0 }
  0xf3   :  { %v461_v57 = vpack.c.bf16 %v426_v56, %v425_v55 }
  0xf4   :  { %v294_v58 = vpop.f32.mrb[12].mxu0 }
  0xf5   :  { %v295_v59 = vadd.f32 %v1336_v30, %v294_v58  ;;  %v904_v60 = vpop.f32.mrb[13].mxu0  ;;  %991 = vmatmul.mubr.bf16.gmra.mrb[4].mxu1 %v461_v57 }
  0xf6   :  { %v297_v61 = vpop.f32.mrb[14].mxu0  ;;  %994 = vmatprep.mubr.msk.bf16.mxu1 %vm1133_vm0, %v1132_v1 }
  0xf7   :  { %v298_v62 = vadd.f32 %v1336_v30, %v297_v61  ;;  %v905_v63 = vpop.f32.mrb[15].mxu0  ;;  %v427_v0 = vmax.f32 %v295_v59, 0.0 }
  0xf9   :  { %v428_v2 = vmax.f32 %v298_v62, 0.0 }
  0xfb   :  { %v462_v3 = vpack.c.bf16 %v428_v2, %v427_v0 }
  0xfc   :  { %v302_v4 = vpop.f32.mrb[16].mxu0 }
  0xfd   :  { %v303_v5 = vadd.f32 %v1336_v30, %v302_v4  ;;  %v908_v6 = vpop.f32.mrb[17].mxu0  ;;  %995 = vmatmul.mubr.bf16.gmra.mrb[8].mxu1 %v462_v3 }
  0xfe   :  { %v305_v7 = vpop.f32.mrb[18].mxu0  ;;  %998 = vmatprep.mubr.msk.bf16.mxu1 %vm1133_vm0, %v1132_v1 }
  0xff   :  { %v306_v8 = vadd.f32 %v1336_v30, %v305_v7  ;;  %v909_v9 = vpop.f32.mrb[19].mxu0  ;;  %v429_v10 = vmax.f32 %v303_v5, 0.0 }
 0x101   :  { %v430_v11 = vmax.f32 %v306_v8, 0.0 }
 0x103   :  { %v463_v12 = vpack.c.bf16 %v430_v11, %v429_v10 }
 0x104   :  { %v310_v13 = vpop.f32.mrb[20].mxu0 }
 0x105   :  { %v311_v14 = vadd.f32 %v1336_v30, %v310_v13  ;;  %v912_v15 = vpop.f32.mrb[21].mxu0  ;;  %999 = vmatmul.mubr.bf16.gmra.mrb[12].mxu1 %v463_v12 }
 0x106   :  { %v313_v16 = vpop.f32.mrb[22].mxu0  ;;  %1002 = vmatprep.mubr.msk.bf16.mxu1 %vm1133_vm0, %v1132_v1 }
 0x107   :  { %v314_v17 = vadd.f32 %v1336_v30, %v313_v16  ;;  %v913_v18 = vpop.f32.mrb[23].mxu0  ;;  %v431_v19 = vmax.f32 %v311_v14, 0.0 }
 0x109   :  { %v432_v20 = vmax.f32 %v314_v17, 0.0 }
 0x10b   :  { %v464_v21 = vpack.c.bf16 %v432_v20, %v431_v19 }
 0x10c   :  { %v318_v22 = vpop.f32.mrb[24].mxu0 }
 0x10d   :  { %v319_v23 = vadd.f32 %v1336_v30, %v318_v22  ;;  %v916_v24 = vpop.f32.mrb[25].mxu0  ;;  %1003 = vmatmul.mubr.bf16.gmra.mrb[16].mxu1 %v464_v21 }
 0x10e   :  { %v321_v25 = vpop.f32.mrb[26].mxu0  ;;  %1006 = vmatprep.mubr.msk.bf16.mxu1 %vm1133_vm0, %v1132_v1 }
 0x10f   :  { %v322_v26 = vadd.f32 %v1336_v30, %v321_v25  ;;  %v917_v27 = vpop.f32.mrb[27].mxu0  ;;  %v433_v28 = vmax.f32 %v319_v23, 0.0 }
 0x111   :  { %v434_v29 = vmax.f32 %v322_v26, 0.0 }
 0x113   :  { %v465_v31 = vpack.c.bf16 %v434_v29, %v433_v28 }
 0x114   :  { %v326_v32 = vpop.f32.mrb[28].mxu0 }
 0x115   :  { %v327_v33 = vadd.f32 %v1336_v30, %v326_v32  ;;  %v920_v34 = vpop.f32.mrb[29].mxu0  ;;  %1007 = vmatmul.mubr.bf16.gmra.mrb[20].mxu1 %v465_v31 }
 0x116   :  { %v329_v35 = vpop.f32.mrb[30].mxu0  ;;  %1010 = vmatprep.mubr.msk.bf16.mxu1 %vm1133_vm0, %v1132_v1 }
 0x117   :  { %v330_v36 = vadd.f32 %v1336_v30, %v329_v35  ;;  %v921_v37 = vpop.f32.mrb[31].mxu0  ;;  %v435_v38 = vmax.f32 %v327_v33, 0.0 }
 0x119   :  { %v436_v39 = vmax.f32 %v330_v36, 0.0 }
 0x11b   :  { %v466_v40 = vpack.c.bf16 %v436_v39, %v435_v38 }
 0x11c   :  { %v334_v41 = vpop.f32.mrb[32].mxu0 }
 0x11d   :  { %v335_v42 = vadd.f32 %v1336_v30, %v334_v41  ;;  %v924_v43 = vpop.f32.mrb[33].mxu0  ;;  %1011 = vmatmul.mubr.bf16.gmra.mrb[24].mxu1 %v466_v40 }
 0x11e   :  { %v337_v44 = vpop.f32.mrb[34].mxu0  ;;  %1014 = vmatprep.mubr.msk.bf16.mxu1 %vm1133_vm0, %v1132_v1 }
 0x11f   :  { %v338_v45 = vadd.f32 %v1336_v30, %v337_v44  ;;  %v925_v46 = vpop.f32.mrb[35].mxu0  ;;  %v437_v47 = vmax.f32 %v335_v42, 0.0 }
 0x121   :  { %v438_v48 = vmax.f32 %v338_v45, 0.0 }
 0x123   :  { %v467_v49 = vpack.c.bf16 %v438_v48, %v437_v47 }
 0x124   :  { %v342_v50 = vpop.f32.mrb[36].mxu0 }
 0x125   :  { %v343_v51 = vadd.f32 %v1336_v30, %v342_v50  ;;  %v928_v52 = vpop.f32.mrb[37].mxu0  ;;  %1015 = vmatmul.mubr.bf16.gmra.mrb[28].mxu1 %v467_v49 }
 0x126   :  { %v345_v53 = vpop.f32.mrb[38].mxu0  ;;  %1018 = vmatprep.mubr.msk.bf16.mxu1 %vm1133_vm0, %v1132_v1 }
 0x127   :  { %v346_v54 = vadd.f32 %v1336_v30, %v345_v53  ;;  %v929_v55 = vpop.f32.mrb[39].mxu0  ;;  %v439_v56 = vmax.f32 %v343_v51, 0.0 }
 0x129   :  { %v440_v57 = vmax.f32 %v346_v54, 0.0 }
 0x12b   :  { %v468_v58 = vpack.c.bf16 %v440_v57, %v439_v56 }
 0x12c   :  { %v350_v59 = vpop.f32.mrb[40].mxu0 }
 0x12d   :  { %v351_v60 = vadd.f32 %v1336_v30, %v350_v59  ;;  %v932_v61 = vpop.f32.mrb[41].mxu0  ;;  %1019 = vmatmul.mubr.bf16.gmra.mrb[32].mxu1 %v468_v58 }
 0x12e   :  { %v353_v62 = vpop.f32.mrb[42].mxu0  ;;  %1022 = vmatprep.mubr.msk.bf16.mxu1 %vm1133_vm0, %v1132_v1 }
 0x12f   :  { %v354_v63 = vadd.f32 %v1336_v30, %v353_v62  ;;  %v933_v0 = vpop.f32.mrb[43].mxu0  ;;  %v441_v2 = vmax.f32 %v351_v60, 0.0 }
 0x131   :  { %v442_v3 = vmax.f32 %v354_v63, 0.0 }
 0x133   :  { %v469_v4 = vpack.c.bf16 %v442_v3, %v441_v2 }
 0x134   :  { %v358_v5 = vpop.f32.mrb[44].mxu0 }
 0x135   :  { %v359_v6 = vadd.f32 %v1336_v30, %v358_v5  ;;  %v936_v7 = vpop.f32.mrb[45].mxu0  ;;  %1023 = vmatmul.mubr.bf16.gmra.mrb[36].mxu1 %v469_v4 }
 0x136   :  { %v361_v8 = vpop.f32.mrb[46].mxu0  ;;  %1026 = vmatprep.mubr.msk.bf16.mxu1 %vm1133_vm0, %v1132_v1 }
 0x137   :  { %v362_v9 = vadd.f32 %v1336_v30, %v361_v8  ;;  %v937_v10 = vpop.f32.mrb[47].mxu0  ;;  %v443_v11 = vmax.f32 %v359_v6, 0.0 }
 0x139   :  { %v444_v12 = vmax.f32 %v362_v9, 0.0 }
 0x13b   :  { %v470_v13 = vpack.c.bf16 %v444_v12, %v443_v11 }
 0x13c   :  { %v366_v14 = vpop.f32.mrb[48].mxu0 }
 0x13d   :  { %v367_v15 = vadd.f32 %v1336_v30, %v366_v14  ;;  %v940_v16 = vpop.f32.mrb[49].mxu0  ;;  %1027 = vmatmul.mubr.bf16.gmra.mrb[40].mxu1 %v470_v13 }
 0x13e   :  { %v369_v17 = vpop.f32.mrb[50].mxu0  ;;  %1030 = vmatprep.mubr.msk.bf16.mxu1 %vm1133_vm0, %v1132_v1 }
 0x13f   :  { %v370_v18 = vadd.f32 %v1336_v30, %v369_v17  ;;  %v941_v19 = vpop.f32.mrb[51].mxu0  ;;  %v445_v20 = vmax.f32 %v367_v15, 0.0  ;;  %v1413_v15 = vld [vmem:[%s1469_s4] ss:$0 sm:$0xff]  ;;  %s1134_s4 = smov [#allocation2]  }
 0x140   :  { %s777_s24 = sshll.u32 %s1134_s4, 4  ;;  %s778_s24 = int_to_ptr.vmem [resolvable:$true] %s777_s24 }
 0x141   :  { %v446_v21 = vmax.f32 %v370_v18, 0.0  ;;  %s1108_s25 = scalar_lea.vmem %s778_s24, 4864  ;;  %p1113_p1 = scmp.lt.s32.totalorder %s778_s24, %s778_s24 }
 0x142   :  { %p1109_p0 = scmp.ne.s32.totalorder %s778_s24, %s1108_s25  ;;  %p1114_p2 = scmp.lt.s32.totalorder %s1108_s25, %s1108_s25 }
 0x143   :  { %v471_v22 = vpack.c.bf16 %v446_v21, %v445_v20 }
 0x144   :  { %v374_v23 = vpop.f32.mrb[52].mxu0  ;;  %p1115_p3 = por %p1114_p2, %p1113_p1 }
 0x145   :  { %v375_v24 = vadd.f32 %v1336_v30, %v374_v23  ;;  %v944_v25 = vpop.f32.mrb[53].mxu0  ;;  %1031 = vmatmul.mubr.bf16.gmra.mrb[44].mxu1 %v471_v22 }
 0x146   :  { %v377_v26 = vpop.f32.mrb[54].mxu0  ;;  %1034 = vmatprep.mubr.msk.bf16.mxu1 %vm1133_vm0, %v1132_v1  ;;  %p1116_p4 = pnand %p1115_p3, %p1109_p0 }
 0x147   :  { %v378_v27 = vadd.f32 %v1336_v30, %v377_v26  ;;  %v945_v28 = vpop.f32.mrb[55].mxu0  ;;  %v447_v29 = vmax.f32 %v375_v24, 0.0 }
 0x149   :  { %v448_v31 = vmax.f32 %v378_v27, 0.0 }
 0x14b   :  { %v472_v32 = vpack.c.bf16 %v448_v31, %v447_v29 }
 0x14c   :  { %v382_v33 = vpop.f32.mrb[56].mxu0 }
 0x14d   :  { %v383_v34 = vadd.f32 %v1336_v30, %v382_v33  ;;  %v948_v35 = vpop.f32.mrb[57].mxu0  ;;  %1035 = vmatmul.mubr.bf16.gmra.mrb[48].mxu1 %v472_v32 }
 0x14e   :  { %v385_v36 = vpop.f32.mrb[58].mxu0  ;;  %1038 = vmatprep.mubr.msk.bf16.mxu1 %vm1133_vm0, %v1132_v1 }
 0x14f   :  { %v386_v37 = vadd.f32 %v1336_v30, %v385_v36  ;;  %v949_v38 = vpop.f32.mrb[59].mxu0  ;;  %v449_v39 = vmax.f32 %v383_v34, 0.0 }
 0x151   :  { %v450_v40 = vmax.f32 %v386_v37, 0.0 }
 0x153   :  { %v473_v41 = vpack.c.bf16 %v450_v40, %v449_v39 }
 0x154   :  { %v390_v42 = vpop.f32.mrb[60].mxu0 }
 0x155   :  { %v391_v43 = vadd.f32 %v1336_v30, %v390_v42  ;;  %v952_v44 = vpop.f32.mrb[61].mxu0  ;;  %1039 = vmatmul.mubr.bf16.gmra.mrb[52].mxu1 %v473_v41 }
 0x156   :  { %v393_v45 = vpop.f32.mrb[62].mxu0  ;;  %1042 = vmatprep.mubr.msk.bf16.mxu1 %vm1133_vm0, %v1132_v1 }
 0x157   :  { %v394_v46 = vadd.f32 %v1336_v30, %v393_v45  ;;  %v953_v47 = vpop.f32.mrb[63].mxu0  ;;  %v451_v48 = vmax.f32 %v391_v43, 0.0 }
 0x159   :  { %v452_v49 = vmax.f32 %v394_v46, 0.0 }
 0x15b   :  { %v474_v50 = vpack.c.bf16 %v452_v49, %v451_v48 }
 0x15c   :  { %v398_v51 = vpop.f32.mrb[64].mxu0 }
 0x15d   :  { %v399_v52 = vadd.f32 %v1336_v30, %v398_v51  ;;  %v956_v53 = vpop.f32.mrb[65].mxu0  ;;  %1043 = vmatmul.mubr.bf16.gmra.mrb[56].mxu1 %v474_v50 }
 0x15e   :  { %v401_v54 = vpop.f32.mrb[66].mxu0  ;;  %1046 = vmatprep.mubr.msk.bf16.mxu1 %vm1133_vm0, %v1132_v1 }
 0x15f   :  { %v402_v55 = vadd.f32 %v1336_v30, %v401_v54  ;;  %v957_v56 = vpop.f32.mrb[67].mxu0  ;;  %v453_v57 = vmax.f32 %v399_v52, 0.0 }
 0x161   :  { %v454_v58 = vmax.f32 %v402_v55, 0.0 }
 0x163   :  { %v475_v59 = vpack.c.bf16 %v454_v58, %v453_v57 }
 0x164   :  { %v406_v60 = vpop.f32.mrb[68].mxu0 }
 0x165   :  { %v407_v61 = vadd.f32 %v1336_v30, %v406_v60  ;;  %v960_v62 = vpop.f32.mrb[69].mxu0  ;;  %1047 = vmatmul.mubr.bf16.gmra.mrb[60].mxu1 %v475_v59 }
 0x166   :  { %v409_v63 = vpop.f32.mrb[70].mxu0  ;;  %1050 = vmatprep.mubr.msk.bf16.mxu1 %vm1133_vm0, %v1132_v1 }
 0x167   :  { %v410_v0 = vadd.f32 %v1336_v30, %v409_v63  ;;  %v961_v2 = vpop.f32.mrb[71].mxu0  ;;  %v455_v3 = vmax.f32 %v407_v61, 0.0 }
 0x169   :  { %v456_v4 = vmax.f32 %v410_v0, 0.0 }
 0x16b   :  { %v476_v5 = vpack.c.bf16 %v456_v4, %v455_v3 }
 0x16c   :  { %v414_v6 = vpop.f32.mrb[72].mxu0 }
 0x16d   :  { %v415_v7 = vadd.f32 %v1336_v30, %v414_v6  ;;  %v964_v8 = vpop.f32.mrb[73].mxu0  ;;  %1051 = vmatmul.mubr.bf16.gmra.mrb[64].mxu1 %v476_v5 }
 0x16e   :  { %v417_v9 = vpop.f32.mrb[74].mxu0  ;;  %1054 = vmatprep.mubr.msk.bf16.mxu1 %vm1133_vm0, %v1132_v1 }
 0x16f   :  { %v418_v10 = vadd.f32 %v1336_v30, %v417_v9  ;;  %v965_v11 = vpop.f32.mrb[75].mxu0  ;;  %v457_v12 = vmax.f32 %v415_v7, 0.0 }
 0x171   :  { %v458_v13 = vmax.f32 %v418_v10, 0.0 }
 0x173   :  { %v477_v14 = vpack.c.bf16 %v458_v13, %v457_v12 }
 0x175   :  { %1055 = vmatmul.mubr.bf16.gmra.mrb[68].mxu1 %v477_v14 }
 0x1b8   :  { %v583_v16 = vpop.f32.mrb[76].mxu0 }
 0x1b9   :  { %v584_v17 = vadd.f32 %v1413_v15, %v583_v16  ;;  %v984_v18 = vpop.f32.mrb[77].mxu0 }
 0x1ba   :  { %v586_v19 = vpop.f32.mrb[78].mxu0 }
 0x1bb   :  { %734 = vst [vmem:[#allocation2] sm:$0xff] %v584_v17  ;;  %v587_v1 = vadd.f32 %v1413_v15, %v586_v19  ;;  %v985_v20 = vpop.f32.mrb[79].mxu0 }
 0x1bd   :  { %735 = vst [vmem:[#allocation2 + $0x8] sm:$0xff] %v587_v1 }
 0x1c0   :  { %v591_v30 = vpop.f32.mrb[0].mxu1 }
 0x1c1   :  { %v592_v21 = vadd.f32 %v1413_v15, %v591_v30  ;;  %v988_v22 = vpop.f32.mrb[1].mxu1 }
 0x1c2   :  { %v594_v23 = vpop.f32.mrb[2].mxu1 }
 0x1c3   :  { %736 = vst [vmem:[#allocation2 + $0x10] sm:$0xff] %v592_v21  ;;  %v595_v24 = vadd.f32 %v1413_v15, %v594_v23  ;;  %v989_v25 = vpop.f32.mrb[3].mxu1 }
 0x1c5   :  { %737 = vst [vmem:[#allocation2 + $0x18] sm:$0xff] %v595_v24 }
 0x1c8   :  { %v599_v26 = vpop.f32.mrb[4].mxu1 }
 0x1c9   :  { %v600_v27 = vadd.f32 %v1413_v15, %v599_v26  ;;  %v992_v28 = vpop.f32.mrb[5].mxu1 }
 0x1ca   :  { %v602_v29 = vpop.f32.mrb[6].mxu1 }
 0x1cb   :  { %738 = vst [vmem:[#allocation2 + $0x20] sm:$0xff] %v600_v27  ;;  %v603_v31 = vadd.f32 %v1413_v15, %v602_v29  ;;  %v993_v32 = vpop.f32.mrb[7].mxu1 }
 0x1cd   :  { %739 = vst [vmem:[#allocation2 + $0x28] sm:$0xff] %v603_v31 }
 0x1d0   :  { %v607_v33 = vpop.f32.mrb[8].mxu1 }
 0x1d1   :  { %v608_v34 = vadd.f32 %v1413_v15, %v607_v33  ;;  %v996_v35 = vpop.f32.mrb[9].mxu1 }
 0x1d2   :  { %v610_v36 = vpop.f32.mrb[10].mxu1 }
 0x1d3   :  { %740 = vst [vmem:[#allocation2 + $0x30] sm:$0xff] %v608_v34  ;;  %v611_v37 = vadd.f32 %v1413_v15, %v610_v36  ;;  %v997_v38 = vpop.f32.mrb[11].mxu1 }
 0x1d5   :  { %741 = vst [vmem:[#allocation2 + $0x38] sm:$0xff] %v611_v37 }
 0x1d8   :  { %v615_v39 = vpop.f32.mrb[12].mxu1 }
 0x1d9   :  { %v616_v40 = vadd.f32 %v1413_v15, %v615_v39  ;;  %v1000_v41 = vpop.f32.mrb[13].mxu1 }
 0x1da   :  { %v618_v42 = vpop.f32.mrb[14].mxu1 }
 0x1db   :  { %742 = vst [vmem:[#allocation2 + $0x40] sm:$0xff] %v616_v40  ;;  %v619_v43 = vadd.f32 %v1413_v15, %v618_v42  ;;  %v1001_v44 = vpop.f32.mrb[15].mxu1 }
 0x1dd   :  { %743 = vst [vmem:[#allocation2 + $0x48] sm:$0xff] %v619_v43 }
 0x1e0   :  { %v623_v45 = vpop.f32.mrb[16].mxu1 }
 0x1e1   :  { %v624_v46 = vadd.f32 %v1413_v15, %v623_v45  ;;  %v1004_v47 = vpop.f32.mrb[17].mxu1 }
 0x1e2   :  { %v626_v48 = vpop.f32.mrb[18].mxu1 }
 0x1e3   :  { %744 = vst [vmem:[#allocation2 + $0x50] sm:$0xff] %v624_v46  ;;  %v627_v49 = vadd.f32 %v1413_v15, %v626_v48  ;;  %v1005_v50 = vpop.f32.mrb[19].mxu1 }
 0x1e5   :  { %745 = vst [vmem:[#allocation2 + $0x58] sm:$0xff] %v627_v49 }
 0x1e8   :  { %v631_v51 = vpop.f32.mrb[20].mxu1 }
 0x1e9   :  { %v632_v52 = vadd.f32 %v1413_v15, %v631_v51  ;;  %v1008_v53 = vpop.f32.mrb[21].mxu1 }
 0x1ea   :  { %v634_v54 = vpop.f32.mrb[22].mxu1 }
 0x1eb   :  { %746 = vst [vmem:[#allocation2 + $0x60] sm:$0xff] %v632_v52  ;;  %v635_v55 = vadd.f32 %v1413_v15, %v634_v54  ;;  %v1009_v56 = vpop.f32.mrb[23].mxu1 }
 0x1ed   :  { %747 = vst [vmem:[#allocation2 + $0x68] sm:$0xff] %v635_v55 }
 0x1f0   :  { %v639_v57 = vpop.f32.mrb[24].mxu1 }
 0x1f1   :  { %v640_v58 = vadd.f32 %v1413_v15, %v639_v57  ;;  %v1012_v59 = vpop.f32.mrb[25].mxu1 }
 0x1f2   :  { %v642_v60 = vpop.f32.mrb[26].mxu1 }
 0x1f3   :  { %748 = vst [vmem:[#allocation2 + $0x70] sm:$0xff] %v640_v58  ;;  %v643_v61 = vadd.f32 %v1413_v15, %v642_v60  ;;  %v1013_v62 = vpop.f32.mrb[27].mxu1 }
 0x1f5   :  { %749 = vst [vmem:[#allocation2 + $0x78] sm:$0xff] %v643_v61 }
 0x1f8   :  { %v647_v63 = vpop.f32.mrb[28].mxu1 }
 0x1f9   :  { %v648_v0 = vadd.f32 %v1413_v15, %v647_v63  ;;  %v1016_v2 = vpop.f32.mrb[29].mxu1 }
 0x1fa   :  { %v650_v3 = vpop.f32.mrb[30].mxu1 }
 0x1fb   :  { %750 = vst [vmem:[#allocation2 + $0x80] sm:$0xff] %v648_v0  ;;  %v651_v4 = vadd.f32 %v1413_v15, %v650_v3  ;;  %v1017_v5 = vpop.f32.mrb[31].mxu1 }
 0x1fd   :  { %751 = vst [vmem:[#allocation2 + $0x88] sm:$0xff] %v651_v4 }
 0x200   :  { %v655_v6 = vpop.f32.mrb[32].mxu1 }
 0x201   :  { %v656_v7 = vadd.f32 %v1413_v15, %v655_v6  ;;  %v1020_v8 = vpop.f32.mrb[33].mxu1 }
 0x202   :  { %v658_v9 = vpop.f32.mrb[34].mxu1 }
 0x203   :  { %752 = vst [vmem:[#allocation2 + $0x90] sm:$0xff] %v656_v7  ;;  %v659_v10 = vadd.f32 %v1413_v15, %v658_v9  ;;  %v1021_v11 = vpop.f32.mrb[35].mxu1 }
 0x205   :  { %753 = vst [vmem:[#allocation2 + $0x98] sm:$0xff] %v659_v10 }
 0x208   :  { %v663_v12 = vpop.f32.mrb[36].mxu1 }
 0x209   :  { %v664_v13 = vadd.f32 %v1413_v15, %v663_v12  ;;  %v1024_v14 = vpop.f32.mrb[37].mxu1 }
 0x20a   :  { %v666_v16 = vpop.f32.mrb[38].mxu1 }
 0x20b   :  { %754 = vst [vmem:[#allocation2 + $0xa0] sm:$0xff] %v664_v13  ;;  %v667_v17 = vadd.f32 %v1413_v15, %v666_v16  ;;  %v1025_v18 = vpop.f32.mrb[39].mxu1 }
 0x20d   :  { %755 = vst [vmem:[#allocation2 + $0xa8] sm:$0xff] %v667_v17 }
 0x210   :  { %v671_v19 = vpop.f32.mrb[40].mxu1 }
 0x211   :  { %v672_v1 = vadd.f32 %v1413_v15, %v671_v19  ;;  %v1028_v20 = vpop.f32.mrb[41].mxu1 }
 0x212   :  { %v674_v30 = vpop.f32.mrb[42].mxu1 }
 0x213   :  { %756 = vst [vmem:[#allocation2 + $0xb0] sm:$0xff] %v672_v1  ;;  %v675_v21 = vadd.f32 %v1413_v15, %v674_v30  ;;  %v1029_v22 = vpop.f32.mrb[43].mxu1 }
 0x215   :  { %757 = vst [vmem:[#allocation2 + $0xb8] sm:$0xff] %v675_v21 }
 0x218   :  { %v679_v23 = vpop.f32.mrb[44].mxu1 }
 0x219   :  { %v680_v24 = vadd.f32 %v1413_v15, %v679_v23  ;;  %v1032_v25 = vpop.f32.mrb[45].mxu1 }
 0x21a   :  { %v682_v26 = vpop.f32.mrb[46].mxu1 }
 0x21b   :  { %758 = vst [vmem:[#allocation2 + $0xc0] sm:$0xff] %v680_v24  ;;  %v683_v27 = vadd.f32 %v1413_v15, %v682_v26  ;;  %v1033_v28 = vpop.f32.mrb[47].mxu1 }
 0x21d   :  { %759 = vst [vmem:[#allocation2 + $0xc8] sm:$0xff] %v683_v27 }
 0x220   :  { %v687_v29 = vpop.f32.mrb[48].mxu1 }
 0x221   :  { %v688_v31 = vadd.f32 %v1413_v15, %v687_v29  ;;  %v1036_v32 = vpop.f32.mrb[49].mxu1 }
 0x222   :  { %v690_v33 = vpop.f32.mrb[50].mxu1 }
 0x223   :  { %760 = vst [vmem:[#allocation2 + $0xd0] sm:$0xff] %v688_v31  ;;  %v691_v34 = vadd.f32 %v1413_v15, %v690_v33  ;;  %v1037_v35 = vpop.f32.mrb[51].mxu1 }
 0x225   :  { %761 = vst [vmem:[#allocation2 + $0xd8] sm:$0xff] %v691_v34 }
 0x228   :  { %v695_v36 = vpop.f32.mrb[52].mxu1 }
 0x229   :  { %v696_v37 = vadd.f32 %v1413_v15, %v695_v36  ;;  %v1040_v38 = vpop.f32.mrb[53].mxu1 }
 0x22a   :  { %v698_v39 = vpop.f32.mrb[54].mxu1 }
 0x22b   :  { %762 = vst [vmem:[#allocation2 + $0xe0] sm:$0xff] %v696_v37  ;;  %v699_v40 = vadd.f32 %v1413_v15, %v698_v39  ;;  %v1041_v41 = vpop.f32.mrb[55].mxu1 }
 0x22d   :  { %763 = vst [vmem:[#allocation2 + $0xe8] sm:$0xff] %v699_v40 }
 0x230   :  { %v703_v42 = vpop.f32.mrb[56].mxu1 }
 0x231   :  { %v704_v43 = vadd.f32 %v1413_v15, %v703_v42  ;;  %v1044_v44 = vpop.f32.mrb[57].mxu1 }
 0x232   :  { %v706_v45 = vpop.f32.mrb[58].mxu1 }
 0x233   :  { %764 = vst [vmem:[#allocation2 + $0xf0] sm:$0xff] %v704_v43  ;;  %v707_v46 = vadd.f32 %v1413_v15, %v706_v45  ;;  %v1045_v47 = vpop.f32.mrb[59].mxu1 }
 0x235   :  { %765 = vst [vmem:[#allocation2 + $0xf8] sm:$0xff] %v707_v46 }
 0x238   :  { %v711_v48 = vpop.f32.mrb[60].mxu1 }
 0x239   :  { %v712_v49 = vadd.f32 %v1413_v15, %v711_v48  ;;  %v1048_v50 = vpop.f32.mrb[61].mxu1 }
 0x23a   :  { %v714_v51 = vpop.f32.mrb[62].mxu1 }
 0x23b   :  { %766 = vst [vmem:[#allocation2 + $0x100] sm:$0xff] %v712_v49  ;;  %v715_v52 = vadd.f32 %v1413_v15, %v714_v51  ;;  %v1049_v53 = vpop.f32.mrb[63].mxu1 }
 0x23d   :  { %767 = vst [vmem:[#allocation2 + $0x108] sm:$0xff] %v715_v52 }
 0x240   :  { %v719_v54 = vpop.f32.mrb[64].mxu1 }
 0x241   :  { %v720_v55 = vadd.f32 %v1413_v15, %v719_v54  ;;  %v1052_v56 = vpop.f32.mrb[65].mxu1 }
 0x242   :  { %v722_v57 = vpop.f32.mrb[66].mxu1 }
 0x243   :  { %768 = vst [vmem:[#allocation2 + $0x110] sm:$0xff] %v720_v55  ;;  %v723_v58 = vadd.f32 %v1413_v15, %v722_v57  ;;  %v1053_v59 = vpop.f32.mrb[67].mxu1 }
 0x245   :  { %769 = vst [vmem:[#allocation2 + $0x118] sm:$0xff] %v723_v58 }
 0x248   :  { %v727_v60 = vpop.f32.mrb[68].mxu1 }
 0x249   :  { %v728_v61 = vadd.f32 %v1413_v15, %v727_v60  ;;  %v1056_v62 = vpop.f32.mrb[69].mxu1 }
 0x24a   :  { %v730_v63 = vpop.f32.mrb[70].mxu1 }
 0x24b   :  { %770 = vst [vmem:[#allocation2 + $0x120] sm:$0xff] %v728_v61  ;;  %v731_v0 = vadd.f32 %v1413_v15, %v730_v63  ;;  %v1057_v2 = vpop.f32.mrb[71].mxu1 }
 0x24d   :  { %771 = vst [vmem:[#allocation2 + $0x128] sm:$0xff] %v731_v0 }
 0x24e   :  { %1119 = shalt.err (!%p1116_p4)
}
 0x24f   :  { %s1120_s28 = scalar_lea.hbm %s1470_s5, 4864 }
 0x250   :  { %p1121_p5 = scmp.ne.s32.totalorder %s1470_s5, %s1120_s28  ;;  %p1124_p6 = scmp.lt.u32.totalorder %s1120_s28, %s1470_s5 }
 0x252   :  { %p1126_p7 = pnand %p1124_p6, %p1121_p5 }
 0x254   :  { %1129 = shalt.err (!%p1126_p7)
}
 0x255   :  { %s1135_s8 = smov 128   ;;  %s1136_s9 = smov 8  }
 0x256   :  { %783 = dma.vmem_to_hbm [thread:$0]  %s778_s24, 4864, %s1470_s5, [#allocation3], %s1135_s8, %s1135_s8, %s1136_s9  }
 0x257   :  { %1130 = dma.done.wait [#allocation3], 4864  }
 0x258   :  { %1131 = vsyncadd [#allocation3], 4294962432 }
 0x259   :  { %787 = vsyncpa [#allocation3], 1 }

</bundles_post_ra>
